<compile_context>
chip_gen: v7x
topology: tpu7x:2x2x1
jax: 0.10.0
libtpu: 0.0.40
codegen_flags: <defaults>
</compile_context>

<pallas_src>
import functools

import jax
import jax.numpy as jnp
from jax import lax
from jax.experimental import pallas as pl
from jax.experimental.pallas import tpu as pltpu


def _round_up(x, m):
    return ((x + m - 1) // m) * m


def _k2_kernel(x_ref, w1_ref, w2_ref, o_ref, *, ni1, ni2, no1, no2):
    """out = x @ kron(W1, W2).T, with the kron operator built on-chip in VMEM."""
    f32 = jnp.float32
    K = ni1 * ni2  # input feature dim  (columns of T)
    N = no1 * no2  # output feature dim (rows of T)

    w1 = w1_ref[...].astype(f32)  # (no1, ni1)
    w2 = w2_ref[...].astype(f32)  # (no2, ni2)

    # m1[i*no2 + j, k*ni2 + l] = W1[i, k]
    #   lane-expand each column of W1 by ni2, then sublane-expand each row by no2.
    w1c = jnp.concatenate(
        [jnp.broadcast_to(w1[:, k:k + 1], (no1, ni2)) for k in range(ni1)],
        axis=1)                                                     # (no1, K)
    m1 = jnp.concatenate(
        [jnp.broadcast_to(w1c[i:i + 1, :], (no2, K)) for i in range(no1)],
        axis=0)                                                     # (N, K)

    # m2[i*no2 + j, k*ni2 + l] = W2[j, l]
    #   tile W2 ni1 times along lanes and no1 times along sublanes.
    m2 = jnp.concatenate([w2] * ni1, axis=1)                        # (no2, K)
    m2 = jnp.concatenate([m2] * no1, axis=0)                        # (N, K)

    t = m1 * m2  # = kron(W1, W2), shape (N, K), exact f32, lives only in VMEM

    # out = x @ T.T   (contract T's last dim; transpose never materialized)
    o_ref[...] = lax.dot_general(
        x_ref[...], t,
        dimension_numbers=(((1,), (1,)), ((), ())),
        preferred_element_type=f32,
    ).astype(o_ref.dtype)
    # NOTE: with several batch blocks the kron is recomputed per block (~cheap
    # VPU/copy work, fully overlapped); at grid=(1,) it is built exactly once.


def k2_net_forward(data, W1, W2, *, block_m=256):
    """data: (B, n_input^2) -> (B, n_output^2); equals torch.mm(data, kron(W1, W2).T)."""
    no1, ni1 = W1.shape
    no2, ni2 = W2.shape
    M, K = data.shape
    N = no1 * no2
    assert K == ni1 * ni2

    # Pad the batch to the f32 sublane multiple (8); cap the row tile at block_m.
    tm = min(block_m, _round_up(M, 8))
    M_pad = _round_up(M, tm)
    x = data if M_pad == M else jnp.pad(data, ((0, M_pad - M), (0, 0)))

    kernel = functools.partial(_k2_kernel, ni1=ni1, ni2=ni2, no1=no1, no2=no2)
    out = pl.pallas_call(
        kernel,
        out_shape=jax.ShapeDtypeStruct((M_pad, N), data.dtype),
        grid_spec=pltpu.PrefetchScalarGridSpec(
            num_scalar_prefetch=0,
            grid=(M_pad // tm,),                               # batch is the only grid axis
            in_specs=[
                pl.BlockSpec((tm, K), lambda i: (i, 0)),       # data rows (full K)
                pl.BlockSpec((no1, ni1), lambda i: (0, 0)),    # W1 (full, ~1 KiB)
                pl.BlockSpec((no2, ni2), lambda i: (0, 0)),    # W2 (full, ~1 KiB)
            ],
            out_specs=pl.BlockSpec((tm, N), lambda i: (i, 0)),  # full-N, lane-dense output
        ),
        compiler_params=pltpu.CompilerParams(
            dimension_semantics=("parallel",),                 # v7x: shard batch across TCs
        ),
    )(x, W1, W2)
    return out if M_pad == M else out[:M]


# ----------------------------------------------------------------------------
# Deterministic "orthogonal" parameter init (mirrors geotorch uniform sample)
# ----------------------------------------------------------------------------
def orthogonal_weight(key, n_output, n_input):
    a = jax.random.normal(key, (max(n_output, n_input), min(n_output, n_input)),
                          dtype=jnp.float32)
    q, r = jnp.linalg.qr(a)
    s = jnp.sign(jnp.diagonal(r))
    s = jnp.where(s == 0, 1.0, s)          # guard against exact-zero diagonal
    q = q * s[None, :]
    if n_output >= n_input:
        return q            # (n_output, n_input), orthonormal columns
    return q.T              # (n_output, n_input), orthonormal rows


if __name__ == "__main__":
    n_input = 16
    n_output = 16
    batch = 8

    key = jax.random.PRNGKey(0)
    k_w1, k_w2, k_x = jax.random.split(key, 3)

    W1 = orthogonal_weight(k_w1, n_output, n_input)                         # (16, 16)
    W2 = orthogonal_weight(k_w2, n_output, n_input)                         # (16, 16)
    data = jax.random.normal(k_x, (batch, n_input * n_input), jnp.float32)  # (8, 256)

    out = jax.block_until_ready(k2_net_forward(data, W1, W2))

    # reference check against plain-JAX kron matmul
    ref = data @ jnp.kron(W1, W2).T
    assert out.shape == (batch, n_output * n_output)
    assert jnp.allclose(out, ref, atol=1e-4, rtol=1e-4)

    print("KERNEL_OK")
</pallas_src>

<mosaic_0001>
module attributes {stable_mosaic.version = 11 : i64} {
  func.func @_k2_kernel(%arg0: i32, %arg1: memref<8x256xf32, #tpu.memory_space<vmem>>, %arg2: memref<16x16xf32, #tpu.memory_space<vmem>>, %arg3: memref<16x16xf32, #tpu.memory_space<vmem>>, %arg4: memref<8x256xf32, #tpu.memory_space<vmem>>) attributes {dimension_semantics = [#tpu.dimension_semantics<parallel>], iteration_bounds = array<i64: 1>, scalar_prefetch = 0 : i64, scratch_operands = 0 : i64, tpu.core_type = #tpu.core_type<tc>, window_params = [{transform_indices = @transform_0, window_bounds = array<i64: 8, 256>}, {pipeline_mode = #tpu.pipeline_mode<synchronous>, transform_indices = @transform_1, window_bounds = array<i64: 16, 16>}, {pipeline_mode = #tpu.pipeline_mode<synchronous>, transform_indices = @transform_2, window_bounds = array<i64: 16, 16>}, {transform_indices = @transform_3, window_bounds = array<i64: 8, 256>}]} {
    %c0 = arith.constant 0 : index
    %c0_0 = arith.constant 0 : index
    %0 = vector.load %arg2[%c0, %c0_0] : memref<16x16xf32, #tpu.memory_space<vmem>>, vector<16x16xf32>
    %c0_1 = arith.constant 0 : index
    %c0_2 = arith.constant 0 : index
    %1 = vector.load %arg3[%c0_1, %c0_2] : memref<16x16xf32, #tpu.memory_space<vmem>>, vector<16x16xf32>
    %2 = vector.extract_strided_slice %0 {offsets = [0, 0], sizes = [16, 1], strides = [1, 1]} : vector<16x16xf32> to vector<16x1xf32>
    %3 = vector.shape_cast %2 : vector<16x1xf32> to vector<16x1xf32>
    %4 = vector.broadcast %3 : vector<16x1xf32> to vector<16x16xf32>
    %5 = vector.extract_strided_slice %0 {offsets = [0, 1], sizes = [16, 1], strides = [1, 1]} : vector<16x16xf32> to vector<16x1xf32>
    %6 = vector.shape_cast %5 : vector<16x1xf32> to vector<16x1xf32>
    %7 = vector.broadcast %6 : vector<16x1xf32> to vector<16x16xf32>
    %8 = vector.extract_strided_slice %0 {offsets = [0, 2], sizes = [16, 1], strides = [1, 1]} : vector<16x16xf32> to vector<16x1xf32>
    %9 = vector.shape_cast %8 : vector<16x1xf32> to vector<16x1xf32>
    %10 = vector.broadcast %9 : vector<16x1xf32> to vector<16x16xf32>
    %11 = vector.extract_strided_slice %0 {offsets = [0, 3], sizes = [16, 1], strides = [1, 1]} : vector<16x16xf32> to vector<16x1xf32>
    %12 = vector.shape_cast %11 : vector<16x1xf32> to vector<16x1xf32>
    %13 = vector.broadcast %12 : vector<16x1xf32> to vector<16x16xf32>
    %14 = vector.extract_strided_slice %0 {offsets = [0, 4], sizes = [16, 1], strides = [1, 1]} : vector<16x16xf32> to vector<16x1xf32>
    %15 = vector.shape_cast %14 : vector<16x1xf32> to vector<16x1xf32>
    %16 = vector.broadcast %15 : vector<16x1xf32> to vector<16x16xf32>
    %17 = vector.extract_strided_slice %0 {offsets = [0, 5], sizes = [16, 1], strides = [1, 1]} : vector<16x16xf32> to vector<16x1xf32>
    %18 = vector.shape_cast %17 : vector<16x1xf32> to vector<16x1xf32>
    %19 = vector.broadcast %18 : vector<16x1xf32> to vector<16x16xf32>
    %20 = vector.extract_strided_slice %0 {offsets = [0, 6], sizes = [16, 1], strides = [1, 1]} : vector<16x16xf32> to vector<16x1xf32>
    %21 = vector.shape_cast %20 : vector<16x1xf32> to vector<16x1xf32>
    %22 = vector.broadcast %21 : vector<16x1xf32> to vector<16x16xf32>
    %23 = vector.extract_strided_slice %0 {offsets = [0, 7], sizes = [16, 1], strides = [1, 1]} : vector<16x16xf32> to vector<16x1xf32>
    %24 = vector.shape_cast %23 : vector<16x1xf32> to vector<16x1xf32>
    %25 = vector.broadcast %24 : vector<16x1xf32> to vector<16x16xf32>
    %26 = vector.extract_strided_slice %0 {offsets = [0, 8], sizes = [16, 1], strides = [1, 1]} : vector<16x16xf32> to vector<16x1xf32>
    %27 = vector.shape_cast %26 : vector<16x1xf32> to vector<16x1xf32>
    %28 = vector.broadcast %27 : vector<16x1xf32> to vector<16x16xf32>
    %29 = vector.extract_strided_slice %0 {offsets = [0, 9], sizes = [16, 1], strides = [1, 1]} : vector<16x16xf32> to vector<16x1xf32>
    %30 = vector.shape_cast %29 : vector<16x1xf32> to vector<16x1xf32>
    %31 = vector.broadcast %30 : vector<16x1xf32> to vector<16x16xf32>
    %32 = vector.extract_strided_slice %0 {offsets = [0, 10], sizes = [16, 1], strides = [1, 1]} : vector<16x16xf32> to vector<16x1xf32>
    %33 = vector.shape_cast %32 : vector<16x1xf32> to vector<16x1xf32>
    %34 = vector.broadcast %33 : vector<16x1xf32> to vector<16x16xf32>
    %35 = vector.extract_strided_slice %0 {offsets = [0, 11], sizes = [16, 1], strides = [1, 1]} : vector<16x16xf32> to vector<16x1xf32>
    %36 = vector.shape_cast %35 : vector<16x1xf32> to vector<16x1xf32>
    %37 = vector.broadcast %36 : vector<16x1xf32> to vector<16x16xf32>
    %38 = vector.extract_strided_slice %0 {offsets = [0, 12], sizes = [16, 1], strides = [1, 1]} : vector<16x16xf32> to vector<16x1xf32>
    %39 = vector.shape_cast %38 : vector<16x1xf32> to vector<16x1xf32>
    %40 = vector.broadcast %39 : vector<16x1xf32> to vector<16x16xf32>
    %41 = vector.extract_strided_slice %0 {offsets = [0, 13], sizes = [16, 1], strides = [1, 1]} : vector<16x16xf32> to vector<16x1xf32>
    %42 = vector.shape_cast %41 : vector<16x1xf32> to vector<16x1xf32>
    %43 = vector.broadcast %42 : vector<16x1xf32> to vector<16x16xf32>
    %44 = vector.extract_strided_slice %0 {offsets = [0, 14], sizes = [16, 1], strides = [1, 1]} : vector<16x16xf32> to vector<16x1xf32>
    %45 = vector.shape_cast %44 : vector<16x1xf32> to vector<16x1xf32>
    %46 = vector.broadcast %45 : vector<16x1xf32> to vector<16x16xf32>
    %47 = vector.extract_strided_slice %0 {offsets = [0, 15], sizes = [16, 1], strides = [1, 1]} : vector<16x16xf32> to vector<16x1xf32>
    %48 = vector.shape_cast %47 : vector<16x1xf32> to vector<16x1xf32>
    %49 = vector.broadcast %48 : vector<16x1xf32> to vector<16x16xf32>
    %50 = tpu.concatenate %4, %7, %10, %13, %16, %19, %22, %25, %28, %31, %34, %37, %40, %43, %46, %49 in 1 : vector<16x16xf32>, vector<16x16xf32>, vector<16x16xf32>, vector<16x16xf32>, vector<16x16xf32>, vector<16x16xf32>, vector<16x16xf32>, vector<16x16xf32>, vector<16x16xf32>, vector<16x16xf32>, vector<16x16xf32>, vector<16x16xf32>, vector<16x16xf32>, vector<16x16xf32>, vector<16x16xf32>, vector<16x16xf32> -> vector<16x256xf32>
    %51 = vector.extract_strided_slice %50 {offsets = [0, 0], sizes = [1, 256], strides = [1, 1]} : vector<16x256xf32> to vector<1x256xf32>
    %52 = vector.shape_cast %51 : vector<1x256xf32> to vector<1x256xf32>
    %53 = vector.broadcast %52 : vector<1x256xf32> to vector<16x256xf32>
    %54 = vector.extract_strided_slice %50 {offsets = [1, 0], sizes = [1, 256], strides = [1, 1]} : vector<16x256xf32> to vector<1x256xf32>
    %55 = vector.shape_cast %54 : vector<1x256xf32> to vector<1x256xf32>
    %56 = vector.broadcast %55 : vector<1x256xf32> to vector<16x256xf32>
    %57 = vector.extract_strided_slice %50 {offsets = [2, 0], sizes = [1, 256], strides = [1, 1]} : vector<16x256xf32> to vector<1x256xf32>
    %58 = vector.shape_cast %57 : vector<1x256xf32> to vector<1x256xf32>
    %59 = vector.broadcast %58 : vector<1x256xf32> to vector<16x256xf32>
    %60 = vector.extract_strided_slice %50 {offsets = [3, 0], sizes = [1, 256], strides = [1, 1]} : vector<16x256xf32> to vector<1x256xf32>
    %61 = vector.shape_cast %60 : vector<1x256xf32> to vector<1x256xf32>
    %62 = vector.broadcast %61 : vector<1x256xf32> to vector<16x256xf32>
    %63 = vector.extract_strided_slice %50 {offsets = [4, 0], sizes = [1, 256], strides = [1, 1]} : vector<16x256xf32> to vector<1x256xf32>
    %64 = vector.shape_cast %63 : vector<1x256xf32> to vector<1x256xf32>
    %65 = vector.broadcast %64 : vector<1x256xf32> to vector<16x256xf32>
    %66 = vector.extract_strided_slice %50 {offsets = [5, 0], sizes = [1, 256], strides = [1, 1]} : vector<16x256xf32> to vector<1x256xf32>
    %67 = vector.shape_cast %66 : vector<1x256xf32> to vector<1x256xf32>
    %68 = vector.broadcast %67 : vector<1x256xf32> to vector<16x256xf32>
    %69 = vector.extract_strided_slice %50 {offsets = [6, 0], sizes = [1, 256], strides = [1, 1]} : vector<16x256xf32> to vector<1x256xf32>
    %70 = vector.shape_cast %69 : vector<1x256xf32> to vector<1x256xf32>
    %71 = vector.broadcast %70 : vector<1x256xf32> to vector<16x256xf32>
    %72 = vector.extract_strided_slice %50 {offsets = [7, 0], sizes = [1, 256], strides = [1, 1]} : vector<16x256xf32> to vector<1x256xf32>
    %73 = vector.shape_cast %72 : vector<1x256xf32> to vector<1x256xf32>
    %74 = vector.broadcast %73 : vector<1x256xf32> to vector<16x256xf32>
    %75 = vector.extract_strided_slice %50 {offsets = [8, 0], sizes = [1, 256], strides = [1, 1]} : vector<16x256xf32> to vector<1x256xf32>
    %76 = vector.shape_cast %75 : vector<1x256xf32> to vector<1x256xf32>
    %77 = vector.broadcast %76 : vector<1x256xf32> to vector<16x256xf32>
    %78 = vector.extract_strided_slice %50 {offsets = [9, 0], sizes = [1, 256], strides = [1, 1]} : vector<16x256xf32> to vector<1x256xf32>
    %79 = vector.shape_cast %78 : vector<1x256xf32> to vector<1x256xf32>
    %80 = vector.broadcast %79 : vector<1x256xf32> to vector<16x256xf32>
    %81 = vector.extract_strided_slice %50 {offsets = [10, 0], sizes = [1, 256], strides = [1, 1]} : vector<16x256xf32> to vector<1x256xf32>
    %82 = vector.shape_cast %81 : vector<1x256xf32> to vector<1x256xf32>
    %83 = vector.broadcast %82 : vector<1x256xf32> to vector<16x256xf32>
    %84 = vector.extract_strided_slice %50 {offsets = [11, 0], sizes = [1, 256], strides = [1, 1]} : vector<16x256xf32> to vector<1x256xf32>
    %85 = vector.shape_cast %84 : vector<1x256xf32> to vector<1x256xf32>
    %86 = vector.broadcast %85 : vector<1x256xf32> to vector<16x256xf32>
    %87 = vector.extract_strided_slice %50 {offsets = [12, 0], sizes = [1, 256], strides = [1, 1]} : vector<16x256xf32> to vector<1x256xf32>
    %88 = vector.shape_cast %87 : vector<1x256xf32> to vector<1x256xf32>
    %89 = vector.broadcast %88 : vector<1x256xf32> to vector<16x256xf32>
    %90 = vector.extract_strided_slice %50 {offsets = [13, 0], sizes = [1, 256], strides = [1, 1]} : vector<16x256xf32> to vector<1x256xf32>
    %91 = vector.shape_cast %90 : vector<1x256xf32> to vector<1x256xf32>
    %92 = vector.broadcast %91 : vector<1x256xf32> to vector<16x256xf32>
    %93 = vector.extract_strided_slice %50 {offsets = [14, 0], sizes = [1, 256], strides = [1, 1]} : vector<16x256xf32> to vector<1x256xf32>
    %94 = vector.shape_cast %93 : vector<1x256xf32> to vector<1x256xf32>
    %95 = vector.broadcast %94 : vector<1x256xf32> to vector<16x256xf32>
    %96 = vector.extract_strided_slice %50 {offsets = [15, 0], sizes = [1, 256], strides = [1, 1]} : vector<16x256xf32> to vector<1x256xf32>
    %97 = vector.shape_cast %96 : vector<1x256xf32> to vector<1x256xf32>
    %98 = vector.broadcast %97 : vector<1x256xf32> to vector<16x256xf32>
    %99 = tpu.concatenate %53, %56, %59, %62, %65, %68, %71, %74, %77, %80, %83, %86, %89, %92, %95, %98 in 0 : vector<16x256xf32>, vector<16x256xf32>, vector<16x256xf32>, vector<16x256xf32>, vector<16x256xf32>, vector<16x256xf32>, vector<16x256xf32>, vector<16x256xf32>, vector<16x256xf32>, vector<16x256xf32>, vector<16x256xf32>, vector<16x256xf32>, vector<16x256xf32>, vector<16x256xf32>, vector<16x256xf32>, vector<16x256xf32> -> vector<256x256xf32>
    %100 = tpu.concatenate %1, %1, %1, %1, %1, %1, %1, %1, %1, %1, %1, %1, %1, %1, %1, %1 in 1 : vector<16x16xf32>, vector<16x16xf32>, vector<16x16xf32>, vector<16x16xf32>, vector<16x16xf32>, vector<16x16xf32>, vector<16x16xf32>, vector<16x16xf32>, vector<16x16xf32>, vector<16x16xf32>, vector<16x16xf32>, vector<16x16xf32>, vector<16x16xf32>, vector<16x16xf32>, vector<16x16xf32>, vector<16x16xf32> -> vector<16x256xf32>
    %101 = tpu.concatenate %100, %100, %100, %100, %100, %100, %100, %100, %100, %100, %100, %100, %100, %100, %100, %100 in 0 : vector<16x256xf32>, vector<16x256xf32>, vector<16x256xf32>, vector<16x256xf32>, vector<16x256xf32>, vector<16x256xf32>, vector<16x256xf32>, vector<16x256xf32>, vector<16x256xf32>, vector<16x256xf32>, vector<16x256xf32>, vector<16x256xf32>, vector<16x256xf32>, vector<16x256xf32>, vector<16x256xf32>, vector<16x256xf32> -> vector<256x256xf32>
    %102 = arith.mulf %99, %101 : vector<256x256xf32>
    %c0_3 = arith.constant 0 : index
    %c0_4 = arith.constant 0 : index
    %103 = vector.load %arg1[%c0_3, %c0_4] : memref<8x256xf32, #tpu.memory_space<vmem>>, vector<8x256xf32>
    %cst = arith.constant dense<0.000000e+00> : vector<8x256xf32>
    %104 = tpu.matmul %103, %102, %cst {dimension_numbers = #tpu.dot_dimension_numbers<[1], [1], [0], [0], [0, 0, 1, 0], [], []>} : vector<8x256xf32>, vector<256x256xf32>, vector<8x256xf32> -> vector<8x256xf32>
    %c0_5 = arith.constant 0 : index
    %c0_6 = arith.constant 0 : index
    %105 = vector.load %arg4[%c0_5, %c0_6] : memref<8x256xf32, #tpu.memory_space<vmem>>, vector<8x256xf32>
    tpu.vector_store %arg4[%c0_5, %c0_6], %104 {strides = array<i32>} : memref<8x256xf32, #tpu.memory_space<vmem>>, vector<8x256xf32>,
    return
  }
  func.func @transform_0(%arg0: i32) -> (i32, i32) {
    %c0_i32 = arith.constant 0 : i32
    %c0_i32_0 = arith.constant 0 : i32
    return %arg0, %c0_i32 : i32, i32
  }
  func.func @transform_1(%arg0: i32) -> (i32, i32) {
    %c0_i32 = arith.constant 0 : i32
    %c0_i32_0 = arith.constant 0 : i32
    %c0_i32_1 = arith.constant 0 : i32
    return %c0_i32, %c0_i32_0 : i32, i32
  }
  func.func @transform_2(%arg0: i32) -> (i32, i32) {
    %c0_i32 = arith.constant 0 : i32
    %c0_i32_0 = arith.constant 0 : i32
    %c0_i32_1 = arith.constant 0 : i32
    return %c0_i32, %c0_i32_0 : i32, i32
  }
  func.func @transform_3(%arg0: i32) -> (i32, i32) {
    %c0_i32 = arith.constant 0 : i32
    %c0_i32_0 = arith.constant 0 : i32
    return %arg0, %c0_i32 : i32, i32
  }
}

</mosaic_0001>

<bundles_post_ra>
// kernel: tpu_custom_call.1
= control target key start
LH: loop header
LB: loop body
LE: loop exit
PB: predicated region body
PF: predicated region fallthrough
CT: control target
= control target key end

     0   :  { %8 = vsyncpa [#allocation3], 0  ;;  %s1136_s0 = inlined_call_operand.hbm [shape: f32[8,256], index: 0, kind: input, shape index: {}]   ;;  %s1137_s1 = inlined_call_operand.hbm [shape: f32[16,16], index: 1, kind: input, shape index: {}]   ;;  %s1138_s2 = inlined_call_operand.hbm [shape: f32[16,16], index: 2, kind: input, shape index: {}]   ;;  %s1139_s3 = inlined_call_operand.hbm [shape: f32[8,256], index: 3, kind: output, shape index: {}]  }
   0x1   :  { %9 = vsyncpa [#allocation6], 0 }
   0x2   :  { %10 = vsyncpa [#allocation4], 0  ;;  %s783_s12 = smov [#allocation5]   ;;  %s689_s16 = scalar_lea.hbm %s1137_s1, 256 }
   0x3   :  { %s26_s13 = sshll.u32 %s783_s12, 4  ;;  %p690_p0 = scmp.ne.s32.totalorder %s1137_s1, %s689_s16  ;;  %s27_s13 = int_to_ptr.vmem [resolvable:$true] %s26_s13 }
   0x4   :  { %p693_p1 = scmp.lt.u32.totalorder %s689_s16, %s1137_s1 }
   0x6   :  { %p695_p2 = pnand %p693_p1, %p690_p0 }
   0x8   :  { %698 = shalt.err (!%p695_p2)
}
   0x9   :  { %s699_s21 = scalar_lea.vmem %s27_s13, 256  ;;  %p704_p4 = scmp.lt.s32.totalorder %s27_s13, %s27_s13 }
   0xa   :  { %p700_p3 = scmp.ne.s32.totalorder %s27_s13, %s699_s21  ;;  %p705_p5 = scmp.lt.s32.totalorder %s699_s21, %s699_s21 }
   0xc   :  { %p706_p6 = por %p705_p5, %p704_p4 }
   0xe   :  { %p707_p7 = pnand %p706_p6, %p700_p3 }
  0x10   :  { %710 = shalt.err (!%p707_p7)
}
  0x11   :  { %s784_s22 = smov 128   ;;  %s785_s23 = smov 8  }
  0x12   :  { %32 = dma.hbm_to_vmem [thread:$0]  %s1137_s1, 256, %s27_s13, [#allocation6], %s784_s22, %s784_s22, %s785_s23  }
  0x13   :  { %s786_s26 = smov [#allocation2]   ;;  %s787_s28 = smov [#allocation7]  }
  0x14   :  { %s17_s27 = sshll.u32 %s786_s26, 4  ;;  %s38_s29 = sshll.u32 %s787_s28, 4  ;;  %s18_s27 = int_to_ptr.vmem [resolvable:$true] %s17_s27  ;;  %s39_s29 = int_to_ptr.vmem [resolvable:$true] %s38_s29 }
  0x15   :  { %s711_s5 = scalar_lea.hbm %s1136_s0, 256 }
  0x16   :  { %p712_p8 = scmp.ne.s32.totalorder %s1136_s0, %s711_s5  ;;  %p715_p9 = scmp.lt.u32.totalorder %s711_s5, %s1136_s0 }
  0x18   :  { %p717_p10 = pnand %p715_p9, %p712_p8 }
  0x1a   :  { %720 = shalt.err (!%p717_p10)
}
  0x1b   :  { %s721_s1 = scalar_lea.vmem %s18_s27, 256  ;;  %p726_p12 = scmp.lt.s32.totalorder %s18_s27, %s18_s27 }
  0x1c   :  { %p722_p11 = scmp.ne.s32.totalorder %s18_s27, %s721_s1  ;;  %p727_p13 = scmp.lt.s32.totalorder %s721_s1, %s721_s1 }
  0x1e   :  { %p728_p0 = por %p727_p13, %p726_p12 }
  0x20   :  { %p729_p1 = pnand %p728_p0, %p722_p11 }
  0x22   :  { %732 = shalt.err (!%p729_p1)
}
  0x23   :  { %20 = dma.hbm_to_vmem [thread:$0]  %s1136_s0, 256, %s18_s27, [#allocation3]  }
  0x24   :  { %s733_s14 = scalar_lea.hbm %s1138_s2, 256 }
  0x25   :  { %p734_p2 = scmp.ne.s32.totalorder %s1138_s2, %s733_s14  ;;  %p737_p3 = scmp.lt.u32.totalorder %s733_s14, %s1138_s2 }
  0x27   :  { %p739_p4 = pnand %p737_p3, %p734_p2 }
  0x29   :  { %742 = shalt.err (!%p739_p4)
}
  0x2a   :  { %s743_s19 = scalar_lea.vmem %s39_s29, 256  ;;  %p748_p6 = scmp.lt.s32.totalorder %s39_s29, %s39_s29 }
  0x2b   :  { %p744_p5 = scmp.ne.s32.totalorder %s39_s29, %s743_s19  ;;  %p749_p7 = scmp.lt.s32.totalorder %s743_s19, %s743_s19 }
  0x2d   :  { %p750_p8 = por %p749_p7, %p748_p6 }
  0x2f   :  { %p751_p9 = pnand %p750_p8, %p744_p5 }
  0x31   :  { %754 = shalt.err (!%p751_p9)
}
  0x32   :  { %44 = dma.hbm_to_vmem [thread:$0]  %s1138_s2, 256, %s39_s29, [#allocation6], %s784_s22, %s784_s22, %s785_s23  }
  0x33   :  { %777 = dma.done.wait [#allocation3], 256  }
  0x34   :  { %778 = vsyncadd [#allocation3], 4294967040 }
  0x35   :  { %779 = dma.done.wait [#allocation6], 512  }
  0x36   :  { %780 = vsyncadd [#allocation6], 4294966784  ;;  %v788_v0 = vmov 8   ;;  %v789_v1 = vmov 0   ;;  %v54_v2 = vld [vmem:[#allocation5] sm:$0xff]  ;;  %v790_v3 = vmov 1   ;;  %v223_v51 = vlaneseq }
  0x37   :  { %657 = vset.pattern.permute.xlu0 %v788_v0  ;;  %658 = vset.pattern.permute.xlu1 %v789_v1  ;;  %v791_v4 = vmov 2   ;;  %v792_v5 = vmov 10   ;;  %v793_v6 = vmov 12   ;;  %v794_v7 = vmov 11   ;;  %v883_v13 = vld [vmem:[#allocation7 + $0x8] sm:$0xff]  ;;  %s801_s2 = smov 16  }
  0x38   :  { %60 = vperm.xlu1 %658, %v54_v2   ;;  %125 = vperm.xlu0 %657, %v54_v2   ;;  %v795_v8 = vmov 5   ;;  %v796_v9 = vmov 3   ;;  %v797_v10 = vmov 15   ;;  %v798_v11 = vmov 4   ;;  %s802_s21 = smov 32   ;;  %s804_s22 = smov 48  }
  0x39   :  { %v799_v12 = vmov 9   ;;  %v800_v14 = vmov 13   ;;  %v803_v15 = vmov 14   ;;  %v805_v16 = vmov 6   ;;  %s806_s23 = smov 64   ;;  %s808_s24 = smov 80  }
  0x3a   :  { %v807_v17 = vmov 7   ;;  %v890_v18 = vld [vmem:[#allocation7] sm:$0xff]  ;;  %s809_s25 = smov 96   ;;  %s810_s26 = smov 112   ;;  %v55_v19 = vld [vmem:[#allocation5 + $0x8] sm:$0xff]  ;;  %vm188_vm0 = vcmask 130048  }
  0x3b   :  { %vm191_vm1 = vcmask 261120   ;;  %vm194_vm2 = vcmask 392192   ;;  %vm197_vm3 = vcmask 523264   ;;  %vm203_vm4 = vcmask 785408   ;;  %s811_s27 = smov [#allocation8]  }
  0x3c   :  { %659 = vset.pattern.permute.xlu1 %v790_v3  ;;  %661 = vset.pattern.permute.xlu0 %v791_v4  ;;  %vm200_vm5 = vcmask 654336   ;;  %v923_v58 = vshrl.u32 %v223_v51, 7  ;;  %vm206_vm6 = vcmask 916480   ;;  %s554_s28 = sshll.u32 %s811_s27, 4  ;;  %s555_s28 = int_to_ptr.vmem [resolvable:$true] %s554_s28 }
  0x3d   :  { %69 = vperm.xlu1 %659, %v54_v2   ;;  %77 = vperm.xlu0 %661, %v54_v2   ;;  %s755_s29 = scalar_lea.vmem %s555_s28, 256  ;;  %p760_p11 = scmp.lt.s32.totalorder %s555_s28, %s555_s28 }
  0x3e   :  { %v994_v51 = vsub.s32 4, %v923_v58  ;;  %p756_p10 = scmp.ne.s32.totalorder %s555_s28, %s755_s29  ;;  %p761_p12 = scmp.lt.s32.totalorder %s755_s29, %s755_s29 }
  0x40   :  { %p762_p13 = por %p761_p12, %p760_p11 }
  0x41   :  { %660 = vset.pattern.permute.xlu1 %v792_v5  ;;  %664 = vset.pattern.permute.xlu0 %v793_v6 }
  0x42   :  { %141 = vperm.xlu1 %660, %v54_v2   ;;  %157 = vperm.xlu0 %664, %v54_v2   ;;  %p763_p0 = pnand %p762_p13, %p756_p10 }
  0x46   :  { %662 = vset.pattern.permute.xlu1 %v794_v7  ;;  %667 = vset.pattern.permute.xlu0 %v795_v8 }
  0x47   :  { %149 = vperm.xlu1 %662, %v54_v2   ;;  %101 = vperm.xlu0 %667, %v54_v2  }
  0x4b   :  { %663 = vset.pattern.permute.xlu1 %v796_v9  ;;  %670 = vset.pattern.permute.xlu0 %v797_v10 }
  0x4c   :  { %85 = vperm.xlu1 %663, %v54_v2   ;;  %181 = vperm.xlu0 %670, %v54_v2  }
  0x50   :  { %665 = vset.pattern.permute.xlu1 %v798_v11  ;;  %671 = vset.pattern.permute.xlu0 %v799_v12 }
  0x51   :  { %93 = vperm.xlu1 %665, %v54_v2   ;;  %133 = vperm.xlu0 %671, %v54_v2  }
  0x55   :  { %666 = vset.pattern.permute.xlu1 %v800_v14  ;;  %355 = vrot.lane.b32.xlu0 %v883_v13, %s801_s2 }
  0x56   :  { %165 = vperm.xlu1 %666, %v54_v2  }
  0x59   :  { %361 = vrot.lane.b32.xlu0 %v883_v13, %s802_s21 }
  0x5a   :  { %668 = vset.pattern.permute.xlu1 %v803_v15 }
  0x5b   :  { %173 = vperm.xlu1 %668, %v54_v2  }
  0x5d   :  { %367 = vrot.lane.b32.xlu0 %v883_v13, %s804_s22 }
  0x5f   :  { %669 = vset.pattern.permute.xlu1 %v805_v16 }
  0x60   :  { %109 = vperm.xlu1 %669, %v54_v2  }
  0x61   :  { %373 = vrot.lane.b32.xlu0 %v883_v13, %s806_s23 }
  0x64   :  { %672 = vset.pattern.permute.xlu1 %v807_v17 }
  0x65   :  { %117 = vperm.xlu1 %672, %v54_v2   ;;  %379 = vrot.lane.b32.xlu0 %v883_v13, %s808_s24 }
  0x69   :  { %353 = vrot.lane.b32.xlu1 %v890_v18, %s801_s2  ;;  %385 = vrot.lane.b32.xlu0 %v883_v13, %s809_s25 }
  0x6a   :  { %673 = vset.pattern.permute.xlu1 %v788_v0 }
  0x6d   :  { %359 = vrot.lane.b32.xlu1 %v890_v18, %s802_s21  ;;  %391 = vrot.lane.b32.xlu0 %v883_v13, %s810_s26 }
  0x71   :  { %365 = vrot.lane.b32.xlu1 %v890_v18, %s804_s22  ;;  %137 = vperm.xlu0 %671, %v55_v19  }
  0x75   :  { %371 = vrot.lane.b32.xlu1 %v890_v18, %s806_s23  ;;  %676 = vset.pattern.permute.xlu0 %v792_v5 }
  0x76   :  { %145 = vperm.xlu0 %676, %v55_v19  }
  0x79   :  { %377 = vrot.lane.b32.xlu1 %v890_v18, %s808_s24 }
  0x7a   :  { %679 = vset.pattern.permute.xlu0 %v796_v9  ;;  %v942_v9 = vsub.s32 1, %v923_v58 }
  0x7b   :  { %89 = vperm.xlu0 %679, %v55_v19  }
  0x7d   :  { %383 = vrot.lane.b32.xlu1 %v890_v18, %s809_s25 }
  0x7f   :  { %682 = vset.pattern.permute.xlu0 %v800_v14 }
  0x80   :  { %169 = vperm.xlu0 %682, %v55_v19  }
  0x81   :  { %389 = vrot.lane.b32.xlu1 %v890_v18, %s810_s26 }
  0x84   :  { %685 = vset.pattern.permute.xlu0 %v805_v16  ;;  %v474_v16 = vld [vmem:[#allocation2 + $0x8] sm:$0xff] }
  0x85   :  { %129 = vperm.xlu1 %673, %v55_v19   ;;  %113 = vperm.xlu0 %685, %v55_v19  }
  0x86   :  { %539 = vmatprep.mubr.f32.mxu0 %v474_v16 }
  0x89   :  { %674 = vset.pattern.permute.xlu1 %v789_v1  ;;  %688 = vset.pattern.permute.xlu0 %v797_v10 }
  0x8a   :  { %65 = vperm.xlu1 %674, %v55_v19  }
  0x8e   :  { %675 = vset.pattern.permute.xlu1 %v790_v3 }
  0x8f   :  { %73 = vperm.xlu1 %675, %v55_v19  }
  0x93   :  { %677 = vset.pattern.permute.xlu1 %v791_v4  ;;  %v934_v4 = vsub.s32 0, %v923_v58 }
  0x94   :  { %81 = vperm.xlu1 %677, %v55_v19  }
  0x98   :  { %678 = vset.pattern.permute.xlu1 %v794_v7 }
  0x99   :  { %153 = vperm.xlu1 %678, %v55_v19  }
  0x9d   :  { %680 = vset.pattern.permute.xlu1 %v793_v6 }
  0x9e   :  { %161 = vperm.xlu1 %680, %v55_v19  }
  0xa2   :  { %681 = vset.pattern.permute.xlu1 %v798_v11 }
  0xa3   :  { %97 = vperm.xlu1 %681, %v55_v19  }
  0xa7   :  { %683 = vset.pattern.permute.xlu1 %v795_v8 }
  0xa8   :  { %105 = vperm.xlu1 %683, %v55_v19  }
  0xac   :  { %684 = vset.pattern.permute.xlu1 %v803_v15 }
  0xad   :  { %177 = vperm.xlu1 %684, %v55_v19  }
  0xb1   :  { %686 = vset.pattern.permute.xlu1 %v797_v10 }
  0xb2   :  { %185 = vperm.xlu1 %686, %v55_v19  }
  0xb6   :  { %687 = vset.pattern.permute.xlu1 %v807_v17 }
  0xb7   :  { %121 = vperm.xlu1 %687, %v55_v19   ;;  %v61_v20 = vpop.permute.xlu1 %60  ;;  %v126_v21 = vpop.permute.xlu0 %125 }
  0xbc   :  { %v70_v22 = vpop.permute.xlu1 %69  ;;  %v78_v23 = vpop.permute.xlu0 %77 }
  0xbd   :  { %v189_v50 = vsel %vm188_vm0, %v61_v20, %v70_v22 }
  0xbe   :  { %v192_v56 = vsel %vm191_vm1, %v189_v50, %v78_v23 }
  0xc1   :  { %v142_v24 = vpop.permute.xlu1 %141  ;;  %v158_v25 = vpop.permute.xlu0 %157 }
  0xc6   :  { %v150_v26 = vpop.permute.xlu1 %149  ;;  %v102_v27 = vpop.permute.xlu0 %101 }
  0xcb   :  { %v86_v28 = vpop.permute.xlu1 %85  ;;  %v182_v29 = vpop.permute.xlu0 %181 }
  0xcc   :  { %v195_v57 = vsel %vm194_vm2, %v192_v56, %v86_v28 }
  0xd0   :  { %v94_v30 = vpop.permute.xlu1 %93  ;;  %v134_v31 = vpop.permute.xlu0 %133 }
  0xd1   :  { %v209_v41 = vsel %vm188_vm0, %v126_v21, %v134_v31  ;;  %v198_v59 = vsel %vm197_vm3, %v195_v57, %v94_v30  ;;  %v970_v30 = vsub.s32 2, %v923_v58 }
  0xd2   :  { %v211_v44 = vsel %vm191_vm1, %v209_v41, %v142_v24  ;;  %v201_v0 = vsel %vm200_vm5, %v198_v59, %v102_v27 }
  0xd3   :  { %v213_v48 = vsel %vm194_vm2, %v211_v44, %v150_v26 }
  0xd4   :  { %v356_v33 = vpop.permute.xlu0 %355  ;;  %v215_v53 = vsel %vm197_vm3, %v213_v48, %v158_v25 }
  0xd5   :  { %v166_v32 = vpop.permute.xlu1 %165  ;;  %v396_v42 = vsel %vm188_vm0, %v883_v13, %v356_v33 }
  0xd6   :  { %v217_v60 = vsel %vm200_vm5, %v215_v53, %v166_v32 }
  0xd8   :  { %v362_v35 = vpop.permute.xlu0 %361 }
  0xd9   :  { %v398_v45 = vsel %vm191_vm1, %v396_v42, %v362_v35 }
  0xda   :  { %v174_v34 = vpop.permute.xlu1 %173 }
  0xdb   :  { %v219_v63 = vsel %vm203_vm4, %v217_v60, %v174_v34 }
  0xdc   :  { %v368_v37 = vpop.permute.xlu0 %367  ;;  %v937_v5 = vsel %vm206_vm6, %v219_v63, %v182_v29 }
  0xdd   :  { %v400_v49 = vsel %vm194_vm2, %v398_v45, %v368_v37  ;;  %v230_v15 = vrot.slane %v937_v5, %v934_v4  ;;  %v238_v20 = vrot.slane %v937_v5, %v942_v9  ;;  %v246_v34 = vrot.slane %v937_v5, %v970_v30 }
  0xde   :  { %v262_v56 = vrot.slane %v937_v5, %v994_v51 }
  0xdf   :  { %v110_v36 = vpop.permute.xlu1 %109 }
  0xe0   :  { %v374_v40 = vpop.permute.xlu0 %373  ;;  %v204_v6 = vsel %vm203_vm4, %v201_v0, %v110_v36 }
  0xe1   :  { %v402_v54 = vsel %vm197_vm3, %v400_v49, %v374_v40  ;;  %v983_v40 = vsub.s32 3, %v923_v58 }
  0xe3   :  { %v254_v45 = vrot.slane %v937_v5, %v983_v40 }
  0xe4   :  { %v118_v38 = vpop.permute.xlu1 %117  ;;  %v380_v46 = vpop.permute.xlu0 %379 }
  0xe5   :  { %v404_v61 = vsel %vm200_vm5, %v402_v54, %v380_v46  ;;  %v945_v10 = vsel %vm206_vm6, %v204_v6, %v118_v38 }
  0xe6   :  { %v226_v19 = vrot.slane %v945_v10, %v934_v4  ;;  %v234_v33 = vrot.slane %v945_v10, %v942_v9  ;;  %v242_v44 = vrot.slane %v945_v10, %v970_v30  ;;  %v250_v54 = vrot.slane %v945_v10, %v983_v40 }
  0xe8   :  { %v354_v39 = vpop.permute.xlu1 %353  ;;  %v386_v55 = vpop.permute.xlu0 %385 }
  0xe9   :  { %v395_v1 = vsel %vm188_vm0, %v890_v18, %v354_v39  ;;  %v406_v2 = vsel %vm203_vm4, %v404_v61, %v386_v55 }
  0xec   :  { %v360_v43 = vpop.permute.xlu1 %359  ;;  %v392_v3 = vpop.permute.xlu0 %391 }
  0xed   :  { %v397_v7 = vsel %vm191_vm1, %v395_v1, %v360_v43  ;;  %v949_v12 = vsel %vm206_vm6, %v406_v2, %v392_v3  ;;  %v258_v2 = vrot.slane %v945_v10, %v994_v51 }
  0xee   :  { %v412_v22 = vmul.f32 %v949_v12, %v230_v15  ;;  %v411_v25 = vmul.f32 %v949_v12, %v226_v19  ;;  %v416_v29 = vmul.f32 %v949_v12, %v238_v20  ;;  %v415_v38 = vmul.f32 %v949_v12, %v234_v33 }
  0xef   :  { %v420_v39 = vmul.f32 %v949_v12, %v246_v34  ;;  %v419_v49 = vmul.f32 %v949_v12, %v242_v44  ;;  %v424_v50 = vmul.f32 %v949_v12, %v254_v45  ;;  %v423_v60 = vmul.f32 %v949_v12, %v250_v54 }
  0xf0   :  { %v366_v47 = vpop.permute.xlu1 %365  ;;  %v428_v61 = vmul.f32 %v949_v12, %v262_v56 }
  0xf1   :  { %v399_v11 = vsel %vm194_vm2, %v397_v7, %v366_v47  ;;  %v138_v7 = vpop.permute.xlu0 %137 }
  0xf4   :  { %v372_v52 = vpop.permute.xlu1 %371 }
  0xf5   :  { %v401_v13 = vsel %vm197_vm3, %v399_v11, %v372_v52 }
  0xf8   :  { %v378_v62 = vpop.permute.xlu1 %377 }
  0xf9   :  { %v403_v14 = vsel %vm200_vm5, %v401_v13, %v378_v62  ;;  %v1005_v62 = vsub.s32 5, %v923_v58  ;;  %v427_v13 = vmul.f32 %v949_v12, %v258_v2 }
  0xfb   :  { %v270_v3 = vrot.slane %v937_v5, %v1005_v62 }
  0xfc   :  { %v384_v8 = vpop.permute.xlu1 %383 }
  0xfd   :  { %v405_v17 = vsel %vm203_vm4, %v403_v14, %v384_v8  ;;  %v432_v14 = vmul.f32 %v949_v12, %v270_v3 }
 0x100   :  { %v390_v18 = vpop.permute.xlu1 %389 }
 0x101   :  { %v961_v21 = vsel %vm206_vm6, %v405_v17, %v390_v18  ;;  %v146_v17 = vpop.permute.xlu0 %145 }
 0x102   :  { %v410_v23 = vmul.f32 %v961_v21, %v230_v15  ;;  %v409_v24 = vmul.f32 %v961_v21, %v226_v19  ;;  %v414_v26 = vmul.f32 %v961_v21, %v238_v20  ;;  %v413_v36 = vmul.f32 %v961_v21, %v234_v33 }
 0x103   :  { %v418_v37 = vmul.f32 %v961_v21, %v246_v34  ;;  %v417_v46 = vmul.f32 %v961_v21, %v242_v44  ;;  %v422_v47 = vmul.f32 %v961_v21, %v254_v45  ;;  %v421_v57 = vmul.f32 %v961_v21, %v250_v54 }
 0x104   :  { %v564_v27 = vpack.c.bf16 %v412_v22, %v410_v23  ;;  %v566_v28 = vpack.c.bf16 %v411_v25, %v409_v24  ;;  %v130_v31 = vpop.permute.xlu1 %129  ;;  %v568_v32 = vpack.c.bf16 %v416_v29, %v414_v26  ;;  %v570_v41 = vpack.c.bf16 %v415_v38, %v413_v36 }
 0x105   :  { %v572_v43 = vpack.c.bf16 %v420_v39, %v418_v37  ;;  %v574_v52 = vpack.c.bf16 %v419_v49, %v417_v46  ;;  %v576_v53 = vpack.c.bf16 %v424_v50, %v422_v47  ;;  %v426_v59 = vmul.f32 %v961_v21, %v262_v56  ;;  %v90_v25 = vpop.permute.xlu0 %89 }
 0x106   :  { %565 = vmatprep.subr.bf16.mxu0 %v564_v27  ;;  %v578_v0 = vpack.c.bf16 %v423_v60, %v421_v57  ;;  %v425_v6 = vmul.f32 %v961_v21, %v258_v2  ;;  %v430_v11 = vmul.f32 %v961_v21, %v270_v3  ;;  %v1016_v15 = vsub.s32 6, %v923_v58 }
 0x107   :  { %567 = vmatpush1.bf16.xpose.msra.mxu0 %v566_v28  ;;  %v580_v1 = vpack.c.bf16 %v428_v61, %v426_v59  ;;  %v266_v20 = vrot.slane %v945_v10, %v1005_v62  ;;  %v210_v23 = vsel %vm188_vm0, %v130_v31, %v138_v7  ;;  %v1029_v33 = vsub.s32 7, %v923_v58 }
 0x108   :  { %569 = vmatprep.subr.bf16.mxu0 %v568_v32  ;;  %v582_v16 = vpack.c.bf16 %v427_v13, %v425_v6  ;;  %v584_v18 = vpack.c.bf16 %v432_v14, %v430_v11  ;;  %v278_v22 = vrot.slane %v937_v5, %v1016_v15  ;;  %v212_v28 = vsel %vm191_vm1, %v210_v23, %v146_v17 }
 0x109   :  { %v976_v35 = vpop.permute.xlu1 %65  ;;  %v429_v24 = vmul.f32 %v961_v21, %v266_v20  ;;  %v431_v27 = vmul.f32 %v949_v12, %v266_v20  ;;  %v170_v38 = vpop.permute.xlu0 %169  ;;  %v282_v59 = vrot.slane %v945_v10, %v1029_v33 }
 0x10a   :  { %v434_v26 = vmul.f32 %v961_v21, %v278_v22  ;;  %v436_v32 = vmul.f32 %v949_v12, %v278_v22 }
 0x10b   :  { %v586_v36 = vpack.c.bf16 %v431_v27, %v429_v24  ;;  %v437_v61 = vmul.f32 %v961_v21, %v282_v59  ;;  %v439_v2 = vmul.f32 %v949_v12, %v282_v59 }
 0x10c   :  { %v588_v39 = vpack.c.bf16 %v436_v32, %v434_v26 }
 0x10d   :  { %v114_v54 = vpop.permute.xlu0 %113  ;;  %v594_v3 = vpack.c.bf16 %v439_v2, %v437_v61 }
 0x10e   :  { %v74_v42 = vpop.permute.xlu1 %73 }
 0x10f   :  { %571 = vmatpush1.bf16.xpose.msra.mxu0 %v570_v41  ;;  %v190_v31 = vsel %vm188_vm0, %v976_v35, %v74_v42  ;;  %v274_v41 = vrot.slane %v945_v10, %v1016_v15 }
 0x110   :  { %573 = vmatprep.subr.bf16.mxu0 %v572_v43  ;;  %v286_v43 = vrot.slane %v937_v5, %v1029_v33 }
 0x111   :  { %v433_v46 = vmul.f32 %v961_v21, %v274_v41  ;;  %v435_v49 = vmul.f32 %v949_v12, %v274_v41 }
 0x112   :  { %v438_v42 = vmul.f32 %v961_v21, %v286_v43  ;;  %v440_v5 = vmul.f32 %v949_v12, %v286_v43 }
 0x113   :  { %v82_v48 = vpop.permute.xlu1 %81 }
 0x114   :  { %v193_v58 = vsel %vm191_vm1, %v190_v31, %v82_v48 }
 0x115   :  { %v196_v50 = vsel %vm194_vm2, %v193_v58, %v90_v25 }
 0x117   :  { %575 = vmatpush1.bf16.xpose.msra.mxu0 %v574_v52  ;;  %v590_v52 = vpack.c.bf16 %v435_v49, %v433_v46 }
 0x118   :  { %v154_v55 = vpop.permute.xlu1 %153  ;;  %577 = vmatprep.subr.bf16.mxu0 %v576_v53 }
 0x119   :  { %v214_v34 = vsel %vm194_vm2, %v212_v28, %v154_v55  ;;  %v592_v55 = vpack.c.bf16 %v440_v5, %v438_v42 }
 0x11d   :  { %v162_v63 = vpop.permute.xlu1 %161 }
 0x11e   :  { %v216_v37 = vsel %vm197_vm3, %v214_v34, %v162_v63 }
 0x11f   :  { %579 = vmatpush1.bf16.xpose.msra.mxu0 %v578_v0  ;;  %v218_v44 = vsel %vm200_vm5, %v216_v37, %v170_v38 }
 0x120   :  { %581 = vmatprep.subr.bf16.mxu0 %v580_v1 }
 0x122   :  { %v98_v8 = vpop.permute.xlu1 %97 }
 0x123   :  { %v199_v48 = vsel %vm197_vm3, %v196_v50, %v98_v8 }
 0x127   :  { %v106_v19 = vpop.permute.xlu1 %105  ;;  %583 = vmatpush1.bf16.xpose.msra.mxu0 %v582_v16 }
 0x128   :  { %585 = vmatprep.subr.bf16.mxu0 %v584_v18  ;;  %v202_v53 = vsel %vm200_vm5, %v199_v48, %v106_v19 }
 0x129   :  { %v205_v60 = vsel %vm203_vm4, %v202_v53, %v114_v54 }
 0x12c   :  { %v178_v29 = vpop.permute.xlu1 %177 }
 0x12d   :  { %v220_v35 = vsel %vm203_vm4, %v218_v44, %v178_v29 }
 0x12f   :  { %587 = vmatpush1.bf16.xpose.msra.mxu0 %v586_v36 }
 0x130   :  { %589 = vmatprep.subr.bf16.mxu0 %v588_v39 }
 0x131   :  { %v186_v45 = vpop.permute.xlu1 %185 }
 0x132   :  { %v1045_v47 = vsel %vm206_vm6, %v220_v35, %v186_v45 }
 0x133   :  { %v294_v56 = vrot.slane %v1045_v47, %v934_v4  ;;  %v302_v10 = vrot.slane %v1045_v47, %v942_v9 }
 0x135   :  { %v442_v0 = vmul.f32 %v961_v21, %v294_v56  ;;  %v444_v1 = vmul.f32 %v949_v12, %v294_v56  ;;  %v446_v13 = vmul.f32 %v961_v21, %v302_v10  ;;  %v448_v14 = vmul.f32 %v949_v12, %v302_v10 }
 0x136   :  { %v122_v57 = vpop.permute.xlu1 %121 }
 0x137   :  { %591 = vmatpush1.bf16.xpose.msra.mxu0 %v590_v52  ;;  %v1059_v63 = vsel %vm206_vm6, %v205_v60, %v122_v57  ;;  %v596_v7 = vpack.c.bf16 %v444_v1, %v442_v0  ;;  %v600_v18 = vpack.c.bf16 %v448_v14, %v446_v13 }
 0x138   :  { %593 = vmatprep.subr.bf16.mxu0 %v592_v55  ;;  %v290_v6 = vrot.slane %v1059_v63, %v934_v4  ;;  %v298_v17 = vrot.slane %v1059_v63, %v942_v9  ;;  %v310_v4 = vrot.slane %v1045_v47, %v970_v30  ;;  %v306_v25 = vrot.slane %v1059_v63, %v970_v30 }
 0x139   :  { %v318_v9 = vrot.slane %v1045_v47, %v983_v40  ;;  %v314_v36 = vrot.slane %v1059_v63, %v983_v40  ;;  %v326_v30 = vrot.slane %v1045_v47, %v994_v51  ;;  %v322_v58 = vrot.slane %v1059_v63, %v994_v51 }
 0x13a   :  { %v441_v8 = vmul.f32 %v961_v21, %v290_v6  ;;  %v443_v11 = vmul.f32 %v949_v12, %v290_v6  ;;  %v445_v19 = vmul.f32 %v961_v21, %v298_v17  ;;  %v447_v20 = vmul.f32 %v949_v12, %v298_v17 }
 0x13b   :  { %v450_v22 = vmul.f32 %v961_v21, %v310_v4  ;;  %v452_v23 = vmul.f32 %v949_v12, %v310_v4  ;;  %v449_v27 = vmul.f32 %v961_v21, %v306_v25  ;;  %v451_v28 = vmul.f32 %v949_v12, %v306_v25 }
 0x13c   :  { %v598_v16 = vpack.c.bf16 %v443_v11, %v441_v8  ;;  %v602_v24 = vpack.c.bf16 %v447_v20, %v445_v19  ;;  %v454_v29 = vmul.f32 %v961_v21, %v318_v9  ;;  %v456_v32 = vmul.f32 %v949_v12, %v318_v9 }
 0x13d   :  { %v604_v26 = vpack.c.bf16 %v452_v23, %v450_v22  ;;  %v606_v34 = vpack.c.bf16 %v451_v28, %v449_v27  ;;  %v453_v37 = vmul.f32 %v961_v21, %v314_v36  ;;  %v455_v38 = vmul.f32 %v949_v12, %v314_v36 }
 0x13e   :  { %v608_v31 = vpack.c.bf16 %v456_v32, %v454_v29  ;;  %v458_v39 = vmul.f32 %v961_v21, %v326_v30  ;;  %v460_v41 = vmul.f32 %v949_v12, %v326_v30  ;;  %v334_v40 = vrot.slane %v1045_v47, %v1005_v62 }
 0x13f   :  { %595 = vmatpush1.bf16.xpose.msra.mxu0 %v594_v3  ;;  %v610_v43 = vpack.c.bf16 %v455_v38, %v453_v37  ;;  %v457_v45 = vmul.f32 %v961_v21, %v322_v58  ;;  %v459_v46 = vmul.f32 %v949_v12, %v322_v58  ;;  %v330_v50 = vrot.slane %v1059_v63, %v1005_v62 }
 0x140   :  { %597 = vmatprep.subr.bf16.mxu0 %v596_v7  ;;  %v612_v44 = vpack.c.bf16 %v460_v41, %v458_v39  ;;  %v462_v35 = vmul.f32 %v961_v21, %v334_v40  ;;  %v464_v42 = vmul.f32 %v949_v12, %v334_v40  ;;  %v342_v51 = vrot.slane %v1045_v47, %v1016_v15  ;;  %v473_v7 = vld [vmem:[#allocation2] sm:$0xff] }
 0x141   :  { %v614_v49 = vpack.c.bf16 %v459_v46, %v457_v45  ;;  %v461_v48 = vmul.f32 %v961_v21, %v330_v50  ;;  %v463_v52 = vmul.f32 %v949_v12, %v330_v50  ;;  %v338_v56 = vrot.slane %v1059_v63, %v1016_v15 }
 0x142   :  { %v616_v5 = vpack.c.bf16 %v464_v42, %v462_v35  ;;  %v466_v53 = vmul.f32 %v961_v21, %v342_v51  ;;  %v468_v54 = vmul.f32 %v949_v12, %v342_v51  ;;  %v350_v62 = vrot.slane %v1045_v47, %v1029_v33 }
 0x143   :  { %v618_v55 = vpack.c.bf16 %v463_v52, %v461_v48  ;;  %v465_v59 = vmul.f32 %v961_v21, %v338_v56  ;;  %v467_v60 = vmul.f32 %v949_v12, %v338_v56  ;;  %v346_v2 = vrot.slane %v1059_v63, %v1029_v33 }
 0x144   :  { %v620_v57 = vpack.c.bf16 %v468_v54, %v466_v53  ;;  %v470_v61 = vmul.f32 %v961_v21, %v350_v62  ;;  %v472_v0 = vmul.f32 %v949_v12, %v350_v62 }
 0x145   :  { %v622_v1 = vpack.c.bf16 %v467_v60, %v465_v59  ;;  %v469_v15 = vmul.f32 %v961_v21, %v346_v2  ;;  %v471_v47 = vmul.f32 %v949_v12, %v346_v2 }
 0x146   :  { %v624_v3 = vpack.c.bf16 %v472_v0, %v470_v61 }
 0x147   :  { %599 = vmatpush1.bf16.xpose.msra.mxu0 %v598_v16  ;;  %v626_v6 = vpack.c.bf16 %v471_v47, %v469_v15 }
 0x148   :  { %601 = vmatprep.subr.bf16.mxu0 %v600_v18 }
 0x14f   :  { %603 = vmatpush1.bf16.xpose.msra.mxu0 %v602_v24 }
 0x150   :  { %605 = vmatprep.subr.bf16.mxu0 %v604_v26 }
 0x157   :  { %607 = vmatpush1.bf16.xpose.msra.mxu0 %v606_v34 }
 0x158   :  { %609 = vmatprep.subr.bf16.mxu0 %v608_v31 }
 0x15f   :  { %611 = vmatpush1.bf16.xpose.msra.mxu0 %v610_v43 }
 0x160   :  { %613 = vmatprep.subr.bf16.mxu0 %v612_v44 }
 0x167   :  { %615 = vmatpush1.bf16.xpose.msra.mxu0 %v614_v49 }
 0x168   :  { %617 = vmatprep.subr.bf16.mxu0 %v616_v5 }
 0x16f   :  { %619 = vmatpush1.bf16.xpose.msra.mxu0 %v618_v55 }
 0x170   :  { %621 = vmatprep.subr.bf16.mxu0 %v620_v57 }
 0x177   :  { %623 = vmatpush1.bf16.xpose.msra.mxu0 %v622_v1 }
 0x178   :  { %625 = vmatprep.subr.bf16.mxu0 %v624_v3 }
 0x17f   :  { %627 = vmatpush1.bf16.xpose.msra.mxu0 %v626_v6 }
 0x186   :  { %540 = vmatmul.mubr.f32.vlgmr.msra.gmra.mrb[0].mxu0 %v473_v7 }
 0x259   :  { %v541_v10 = vpop.f32.mrb[0].mxu0 }
 0x25a   :  { %546 = vst [vmem:[#allocation8] sm:$0xff] %v541_v10  ;;  %v543_v8 = vpop.f32.mrb[1].mxu0 }
 0x25b   :  { %547 = vst [vmem:[#allocation8 + $0x8] sm:$0xff] %v543_v8 }
 0x25c   :  { %766 = shalt.err (!%p763_p0)
}
 0x25d   :  { %s767_s5 = scalar_lea.hbm %s1139_s3, 256 }
 0x25e   :  { %p768_p1 = scmp.ne.s32.totalorder %s1139_s3, %s767_s5  ;;  %p771_p2 = scmp.lt.u32.totalorder %s767_s5, %s1139_s3 }
 0x260   :  { %p773_p3 = pnand %p771_p2, %p768_p1 }
 0x262   :  { %776 = shalt.err (!%p773_p3)
}
 0x263   :  { %557 = dma.vmem_to_hbm [thread:$0]  %s555_s28, 256, %s1139_s3, [#allocation4]  }
 0x264   :  { %781 = dma.done.wait [#allocation4], 256  }
 0x265   :  { %782 = vsyncadd [#allocation4], 4294967040 }
 0x266   :  { %561 = vsyncpa [#allocation3], 1 }
 0x267   :  { %562 = vsyncpa [#allocation6], 1 }
 0x268   :  { %563 = vsyncpa [#allocation4], 1 }

</bundles_post_ra>
